<compile_context>
chip_gen: v5e
topology: v5e:2x2
jax: 0.10.0
libtpu: 0.0.40
codegen_flags: <defaults>
</compile_context>

<pallas_src>
import functools

import jax
import jax.numpy as jnp
from jax.experimental import pallas as pl
from jax.experimental.pallas import tpu as pltpu

BN_EPS = 1e-5
KSIZE = 4
STRIDE = 2
PADDING = 1


# --------------------------------------------------------------------------- #
# Pallas kernels
# --------------------------------------------------------------------------- #
def convt_stats_kernel(p_ref, w_ref, sum_ref, sq_ref):
    """Pass A: conv-transpose matmul + global per-(parity, channel) sum / sumsq."""
    @pl.when(pl.program_id(0) == 0)
    def _init():
        sum_ref[...] = jnp.zeros_like(sum_ref)
        sq_ref[...] = jnp.zeros_like(sq_ref)

    # [TM, 9*Cin] (bf16) @ [9*Cin, 4*Cout] (bf16) -> f32 on the MXU.
    y = jnp.dot(p_ref[...], w_ref[...], preferred_element_type=jnp.float32)

    # Single pass over the tile: sum and sum-of-squares (var = E[y^2] - mean^2
    # later, guarded by eps / clamping, all in f32).
    sum_ref[...] += jnp.sum(y, axis=0, keepdims=True)
    sq_ref[...] += jnp.sum(y * y, axis=0, keepdims=True)


def convt_norm_kernel(p_ref, w_ref, ss_ref, o_ref):
    """Pass B: conv-transpose matmul + fused BatchNorm normalize/affine."""
    y = jnp.dot(p_ref[...], w_ref[...], preferred_element_type=jnp.float32)
    scale = ss_ref[0:1, :]          # [1, 4*Cout]  (gamma * rsqrt(var + eps))
    shift = ss_ref[1:2, :]          # [1, 4*Cout]  (beta - mean * scale)
    o_ref[...] = (y * scale + shift).astype(o_ref.dtype)


# --------------------------------------------------------------------------- #
# Host-side glue (layout only; done ONCE per forward, not per tile)
# --------------------------------------------------------------------------- #
def _build_patches(x_nhwc):
    """[N,H,W,Cin] -> [N*H*W, 9*Cin]: 3x3 neighbourhood of the zero-padded input."""
    n, h, w, c = x_nhwc.shape
    xp = jnp.pad(x_nhwc, ((0, 0), (1, 1), (1, 1), (0, 0)))
    cols = []
    for r in range(3):
        for s in range(3):
            cols.append(xp[:, r:r + h, s:s + w, :])
    pat = jnp.stack(cols, axis=3)                       # [N, H, W, 9, Cin]
    return pat.reshape(n * h * w, 9 * c)


# (output parity, patch offset) -> ConvTranspose kernel tap, for k=4, s=2, p=1:
#   parity 0: patch row 0 -> tap 3, patch row 1 -> tap 1, patch row 2 unused
#   parity 1: patch row 1 -> tap 2, patch row 2 -> tap 0, patch row 0 unused
_TAP = {(0, 0): 3, (0, 1): 1, (1, 1): 2, (1, 2): 0}


def _build_wmat(w):
    """PyTorch ConvTranspose2d weight [Cin, Cout, 4, 4] -> [9*Cin, 4*Cout]."""
    cin, cout = w.shape[0], w.shape[1]
    wm = jnp.zeros((3, 3, cin, 2, 2, cout), w.dtype)
    for (py, r), ky in _TAP.items():
        for (px, s), kx in _TAP.items():
            wm = wm.at[r, s, :, py, px, :].set(w[:, :, ky, kx])
    return wm.reshape(9 * cin, 4 * cout)


# --------------------------------------------------------------------------- #
# Fused forward
# --------------------------------------------------------------------------- #
def convt_bn_forward(x_nchw, w, b, gamma, beta, *, tm=256):
    """ConvTranspose2d(k=4, s=2, p=1) + train-mode BatchNorm2d, fused on TPU."""
    del b  # conv bias cancels exactly in (y - mean) under train-mode BatchNorm.
    n, cin, h, wd = x_nchw.shape
    cout = w.shape[1]
    r = n * h * wd
    kc = 9 * cin
    oc = 4 * cout

    # channel-last once; bf16 matmul operands (stats / BN math stay f32).
    x_nhwc = jnp.transpose(x_nchw, (0, 2, 3, 1))
    patches = _build_patches(x_nhwc).astype(jnp.bfloat16)      # [R, 9*Cin]
    w_mat = _build_wmat(w).astype(jnp.bfloat16)                # [9*Cin, 4*Cout]

    # Pad rows to a multiple of tm; zero rows contribute exactly 0 to sum/sumsq
    # (no bias in the kernel) and are sliced off after pass B.
    n_tiles = (r + tm - 1) // tm
    r_pad = n_tiles * tm
    if r_pad != r:
        patches = jnp.pad(patches, ((0, r_pad - r), (0, 0)))

    vmem_params = dict(vmem_limit_bytes=32 * 1024 * 1024)

    # ---- pass A: global BN statistics (row-tiled reduction, resident acc) ----
    sum_p, sq_p = pl.pallas_call(
        convt_stats_kernel,
        out_shape=(jax.ShapeDtypeStruct((1, oc), jnp.float32),
                   jax.ShapeDtypeStruct((1, oc), jnp.float32)),
        grid=(n_tiles,),
        in_specs=[pl.BlockSpec((tm, kc), lambda i: (i, 0)),
                  pl.BlockSpec((kc, oc), lambda i: (0, 0))],
        out_specs=(pl.BlockSpec((1, oc), lambda i: (0, 0)),
                   pl.BlockSpec((1, oc), lambda i: (0, 0))),
        compiler_params=pltpu.CompilerParams(
            dimension_semantics=("arbitrary",), **vmem_params),
    )(patches, w_mat)

    # ---- tiny glue on C-length vectors: fold stats + gamma/beta -> scale/shift
    count = jnp.float32(4 * r)                  # N * (2H) * (2W) per out channel
    sum_c = jnp.sum(sum_p.reshape(4, cout), axis=0)
    sq_c = jnp.sum(sq_p.reshape(4, cout), axis=0)
    mean = sum_c / count
    var = jnp.maximum(sq_c / count - mean * mean, 0.0)
    scale_c = gamma * jax.lax.rsqrt(var + BN_EPS)
    shift_c = beta - mean * scale_c
    # Broadcast to the packed (py, px, co) lane layout; ONE small (2, 4*Cout) DMA.
    ss = jnp.stack([jnp.tile(scale_c, 4), jnp.tile(shift_c, 4)], axis=0)

    # ---- pass B: recompute conv + fused normalize/affine (row-parallel) ------
    y_flat = pl.pallas_call(
        convt_norm_kernel,
        out_shape=jax.ShapeDtypeStruct((r_pad, oc), jnp.float32),
        grid=(n_tiles,),
        in_specs=[pl.BlockSpec((tm, kc), lambda i: (i, 0)),
                  pl.BlockSpec((kc, oc), lambda i: (0, 0)),
                  pl.BlockSpec((2, oc), lambda i: (0, 0))],
        out_specs=pl.BlockSpec((tm, oc), lambda i: (i, 0)),
        compiler_params=pltpu.CompilerParams(
            dimension_semantics=("parallel",), **vmem_params),
    )(patches, w_mat, ss)

    # ---- glue: un-interleave the (py, px) parities into the 2x spatial grid ---
    y = y_flat[:r].reshape(n, h, wd, 2, 2, cout)
    y = jnp.transpose(y, (0, 1, 3, 2, 4, 5)).reshape(n, STRIDE * h, STRIDE * wd, cout)
    return jnp.transpose(y, (0, 3, 1, 2))                       # back to NCHW


# --------------------------------------------------------------------------- #
# Pure-JAX reference (PyTorch semantics: ConvTranspose2d + train-mode BN)
# --------------------------------------------------------------------------- #
def convt_bn_reference(x, w, b, gamma, beta):
    k = w.shape[2]
    w_flip = jnp.flip(w, axis=(2, 3))                   # spatial flip
    w_oihw = jnp.transpose(w_flip, (1, 0, 2, 3))        # [Cout, Cin, kH, kW]
    pad = k - 1 - PADDING
    y = jax.lax.conv_general_dilated(
        x, w_oihw, window_strides=(1, 1),
        padding=((pad, pad), (pad, pad)),
        lhs_dilation=(STRIDE, STRIDE),
        dimension_numbers=("NCHW", "OIHW", "NCHW"))
    y = y + b[None, :, None, None]
    mean = jnp.mean(y, axis=(0, 2, 3), keepdims=True)
    var = jnp.mean((y - mean) ** 2, axis=(0, 2, 3), keepdims=True)
    y = (y - mean) * jax.lax.rsqrt(var + BN_EPS)
    return y * gamma[None, :, None, None] + beta[None, :, None, None]


# --------------------------------------------------------------------------- #
if __name__ == "__main__":
    key = jax.random.PRNGKey(0)
    kx, kw, kb, kg, kbe = jax.random.split(key, 5)

    N, Cin, H, W = 2, 8, 16, 16        # ConvTBatchBlock(in_c=8, out_c=4)
    Cout = 4

    x = jax.random.normal(kx, (N, Cin, H, W), jnp.float32)
    bound = float(1.0 / (Cin * KSIZE * KSIZE) ** 0.5)
    w = jax.random.uniform(kw, (Cin, Cout, KSIZE, KSIZE), jnp.float32, -bound, bound)
    b = jax.random.uniform(kb, (Cout,), jnp.float32, -bound, bound)
    gamma = 1.0 + 0.1 * jax.random.normal(kg, (Cout,), jnp.float32)
    beta = 0.1 * jax.random.normal(kbe, (Cout,), jnp.float32)

    fwd = jax.jit(functools.partial(convt_bn_forward, tm=256))
    out = jax.block_until_ready(fwd(x, w, b, gamma, beta))

    ref = jax.block_until_ready(convt_bn_reference(x, w, b, gamma, beta))
    assert out.shape == ref.shape == (N, Cout, STRIDE * H, STRIDE * W)
    max_err = float(jnp.max(jnp.abs(out - ref)))
    assert jnp.allclose(out, ref, rtol=3e-2, atol=3e-2), f"max abs diff {max_err}"
    print("KERNEL_OK")
</pallas_src>

<mosaic_0001>
module attributes {stable_mosaic.version = 11 : i64} {
  func.func @convt_stats_kernel(%arg0: i32, %arg1: memref<256x72xbf16, #tpu.memory_space<vmem>>, %arg2: memref<72x16xbf16, #tpu.memory_space<vmem>>, %arg3: memref<1x16xf32, #tpu.memory_space<vmem>>, %arg4: memref<1x16xf32, #tpu.memory_space<vmem>>) attributes {dimension_semantics = [#tpu.dimension_semantics<arbitrary>], iteration_bounds = array<i64: 2>, scalar_prefetch = 0 : i64, scratch_operands = 0 : i64, tpu.core_type = #tpu.core_type<tc>, window_params = [{transform_indices = @transform_0, window_bounds = array<i64: 256, 72>}, {pipeline_mode = #tpu.pipeline_mode<synchronous>, transform_indices = @transform_1, window_bounds = array<i64: 72, 16>}, {pipeline_mode = #tpu.pipeline_mode<synchronous>, transform_indices = @transform_2, window_bounds = array<i64: 1, 16>}, {pipeline_mode = #tpu.pipeline_mode<synchronous>, transform_indices = @transform_3, window_bounds = array<i64: 1, 16>}]} {
    %c0_i32 = arith.constant 0 : i32
    %0 = arith.cmpi eq, %arg0, %c0_i32 : i32
    %1 = arith.extui %0 : i1 to i32
    %c0_i32_0 = arith.constant 0 : i32
    %2 = arith.cmpi ne, %1, %c0_i32_0 : i32
    scf.if %2 {
      %cst_14 = arith.constant 0.000000e+00 : f32
      %17 = vector.broadcast %cst_14 : f32 to vector<1x16xf32>
      %c0_15 = arith.constant 0 : index
      %c0_16 = arith.constant 0 : index
      %18 = vector.load %arg3[%c0_15, %c0_16] : memref<1x16xf32, #tpu.memory_space<vmem>>, vector<1x16xf32>
      tpu.vector_store %arg3[%c0_15, %c0_16], %17 {strides = array<i32>} : memref<1x16xf32, #tpu.memory_space<vmem>>, vector<1x16xf32>,
      %cst_17 = arith.constant 0.000000e+00 : f32
      %19 = vector.broadcast %cst_17 : f32 to vector<1x16xf32>
      %c0_18 = arith.constant 0 : index
      %c0_19 = arith.constant 0 : index
      %20 = vector.load %arg4[%c0_18, %c0_19] : memref<1x16xf32, #tpu.memory_space<vmem>>, vector<1x16xf32>
      tpu.vector_store %arg4[%c0_18, %c0_19], %19 {strides = array<i32>} : memref<1x16xf32, #tpu.memory_space<vmem>>, vector<1x16xf32>,
    } else {
    }
    %c0 = arith.constant 0 : index
    %c0_1 = arith.constant 0 : index
    %3 = vector.load %arg1[%c0, %c0_1] : memref<256x72xbf16, #tpu.memory_space<vmem>>, vector<256x72xbf16>
    %c0_2 = arith.constant 0 : index
    %c0_3 = arith.constant 0 : index
    %4 = vector.load %arg2[%c0_2, %c0_3] : memref<72x16xbf16, #tpu.memory_space<vmem>>, vector<72x16xbf16>
    %cst = arith.constant dense<0.000000e+00> : vector<256x16xf32>
    %5 = tpu.matmul %3, %4, %cst {dimension_numbers = #tpu.dot_dimension_numbers<[1], [0], [0], [1], [0, 0, 1, 1], [], []>} : vector<256x72xbf16>, vector<72x16xbf16>, vector<256x16xf32> -> vector<256x16xf32>
    %c0_4 = arith.constant 0 : index
    %c0_5 = arith.constant 0 : index
    %6 = vector.load %arg3[%c0_4, %c0_5] : memref<1x16xf32, #tpu.memory_space<vmem>>, vector<1x16xf32>
    %cst_6 = arith.constant dense<0.000000e+00> : vector<16xf32>
    %7 = vector.multi_reduction <add>, %5, %cst_6 [0] : vector<256x16xf32> to vector<16xf32>
    %8 = vector.shape_cast %7 : vector<16xf32> to vector<1x16xf32>
    %9 = arith.addf %6, %8 : vector<1x16xf32>
    %c0_7 = arith.constant 0 : index
    %c0_8 = arith.constant 0 : index
    %10 = vector.load %arg3[%c0_7, %c0_8] : memref<1x16xf32, #tpu.memory_space<vmem>>, vector<1x16xf32>
    tpu.vector_store %arg3[%c0_7, %c0_8], %9 {strides = array<i32>} : memref<1x16xf32, #tpu.memory_space<vmem>>, vector<1x16xf32>,
    %c0_9 = arith.constant 0 : index
    %c0_10 = arith.constant 0 : index
    %11 = vector.load %arg4[%c0_9, %c0_10] : memref<1x16xf32, #tpu.memory_space<vmem>>, vector<1x16xf32>
    %12 = arith.mulf %5, %5 : vector<256x16xf32>
    %cst_11 = arith.constant dense<0.000000e+00> : vector<16xf32>
    %13 = vector.multi_reduction <add>, %12, %cst_11 [0] : vector<256x16xf32> to vector<16xf32>
    %14 = vector.shape_cast %13 : vector<16xf32> to vector<1x16xf32>
    %15 = arith.addf %11, %14 : vector<1x16xf32>
    %c0_12 = arith.constant 0 : index
    %c0_13 = arith.constant 0 : index
    %16 = vector.load %arg4[%c0_12, %c0_13] : memref<1x16xf32, #tpu.memory_space<vmem>>, vector<1x16xf32>
    tpu.vector_store %arg4[%c0_12, %c0_13], %15 {strides = array<i32>} : memref<1x16xf32, #tpu.memory_space<vmem>>, vector<1x16xf32>,
    return
  }
  func.func @transform_0(%arg0: i32) -> (i32, i32) {
    %c0_i32 = arith.constant 0 : i32
    %c0_i32_0 = arith.constant 0 : i32
    return %arg0, %c0_i32 : i32, i32
  }
  func.func @transform_1(%arg0: i32) -> (i32, i32) {
    %c0_i32 = arith.constant 0 : i32
    %c0_i32_0 = arith.constant 0 : i32
    %c0_i32_1 = arith.constant 0 : i32
    return %c0_i32, %c0_i32_0 : i32, i32
  }
  func.func @transform_2(%arg0: i32) -> (i32, i32) {
    %c0_i32 = arith.constant 0 : i32
    %c0_i32_0 = arith.constant 0 : i32
    %c0_i32_1 = arith.constant 0 : i32
    return %c0_i32, %c0_i32_0 : i32, i32
  }
  func.func @transform_3(%arg0: i32) -> (i32, i32) {
    %c0_i32 = arith.constant 0 : i32
    %c0_i32_0 = arith.constant 0 : i32
    %c0_i32_1 = arith.constant 0 : i32
    return %c0_i32, %c0_i32_0 : i32, i32
  }
}

module attributes {stable_mosaic.version = 11 : i64} {
  func.func @convt_norm_kernel(%arg0: i32, %arg1: memref<256x72xbf16, #tpu.memory_space<vmem>>, %arg2: memref<72x16xbf16, #tpu.memory_space<vmem>>, %arg3: memref<2x16xf32, #tpu.memory_space<vmem>>, %arg4: memref<256x16xf32, #tpu.memory_space<vmem>>) attributes {dimension_semantics = [#tpu.dimension_semantics<parallel>], iteration_bounds = array<i64: 2>, scalar_prefetch = 0 : i64, scratch_operands = 0 : i64, tpu.core_type = #tpu.core_type<tc>, window_params = [{transform_indices = @transform_0, window_bounds = array<i64: 256, 72>}, {pipeline_mode = #tpu.pipeline_mode<synchronous>, transform_indices = @transform_1, window_bounds = array<i64: 72, 16>}, {pipeline_mode = #tpu.pipeline_mode<synchronous>, transform_indices = @transform_2, window_bounds = array<i64: 2, 16>}, {transform_indices = @transform_3, window_bounds = array<i64: 256, 16>}]} {
    %c0 = arith.constant 0 : index
    %c0_0 = arith.constant 0 : index
    %0 = vector.load %arg1[%c0, %c0_0] : memref<256x72xbf16, #tpu.memory_space<vmem>>, vector<256x72xbf16>
    %c0_1 = arith.constant 0 : index
    %c0_2 = arith.constant 0 : index
    %1 = vector.load %arg2[%c0_1, %c0_2] : memref<72x16xbf16, #tpu.memory_space<vmem>>, vector<72x16xbf16>
    %cst = arith.constant dense<0.000000e+00> : vector<256x16xf32>
    %2 = tpu.matmul %0, %1, %cst {dimension_numbers = #tpu.dot_dimension_numbers<[1], [0], [0], [1], [0, 0, 1, 1], [], []>} : vector<256x72xbf16>, vector<72x16xbf16>, vector<256x16xf32> -> vector<256x16xf32>
    %c0_3 = arith.constant 0 : index
    %c0_4 = arith.constant 0 : index
    %3 = vector.load %arg3[%c0_3, %c0_4] : memref<2x16xf32, #tpu.memory_space<vmem>>, vector<1x16xf32>
    %c1 = arith.constant 1 : index
    %c0_5 = arith.constant 0 : index
    %4 = vector.load %arg3[%c1, %c0_5] : memref<2x16xf32, #tpu.memory_space<vmem>>, vector<1x16xf32>
    %5 = vector.broadcast %3 : vector<1x16xf32> to vector<256x16xf32>
    %6 = arith.mulf %2, %5 : vector<256x16xf32>
    %7 = vector.broadcast %4 : vector<1x16xf32> to vector<256x16xf32>
    %8 = arith.addf %6, %7 : vector<256x16xf32>
    %c0_6 = arith.constant 0 : index
    %c0_7 = arith.constant 0 : index
    %9 = vector.load %arg4[%c0_6, %c0_7] : memref<256x16xf32, #tpu.memory_space<vmem>>, vector<256x16xf32>
    tpu.vector_store %arg4[%c0_6, %c0_7], %8 {strides = array<i32>} : memref<256x16xf32, #tpu.memory_space<vmem>>, vector<256x16xf32>,
    return
  }
  func.func @transform_0(%arg0: i32) -> (i32, i32) {
    %c0_i32 = arith.constant 0 : i32
    %c0_i32_0 = arith.constant 0 : i32
    return %arg0, %c0_i32 : i32, i32
  }
  func.func @transform_1(%arg0: i32) -> (i32, i32) {
    %c0_i32 = arith.constant 0 : i32
    %c0_i32_0 = arith.constant 0 : i32
    %c0_i32_1 = arith.constant 0 : i32
    return %c0_i32, %c0_i32_0 : i32, i32
  }
  func.func @transform_2(%arg0: i32) -> (i32, i32) {
    %c0_i32 = arith.constant 0 : i32
    %c0_i32_0 = arith.constant 0 : i32
    %c0_i32_1 = arith.constant 0 : i32
    return %c0_i32, %c0_i32_0 : i32, i32
  }
  func.func @transform_3(%arg0: i32) -> (i32, i32) {
    %c0_i32 = arith.constant 0 : i32
    %c0_i32_0 = arith.constant 0 : i32
    return %arg0, %c0_i32 : i32, i32
  }
}

</mosaic_0001>

<bundles_post_ra>
// kernel: tile.17
= control target key start
LH: loop header
LB: loop body
LE: loop exit
PB: predicated region body
PF: predicated region fallthrough
CT: control target
= control target key end

     0   :  { %s22_s0 = inlined_call_operand.vmem [shape: f32[4], index: 0, kind: input, shape index: {}]   ;;  %s23_s1 = inlined_call_operand.vmem [shape: f32[4,4], index: 1, kind: output, shape index: {}]  }
   0x1   :  { %v4_v0 = vld [vmem:[%s22_s0] ss:$0 sm:$0xff] }
   0x2   :  { %5 = vst [vmem:[%s23_s1] sm:$0xf] %v4_v0 }

// kernel: tile.19
= control target key start
LH: loop header
LB: loop body
LE: loop exit
PB: predicated region body
PF: predicated region fallthrough
CT: control target
= control target key end

     0   :  { %s37_s8 = smov 4   ;;  %s38_s9 = smov 8   ;;  %vm7_vm0 = vcmask 31744   ;;  %vm13_vm1 = vcmask 130144   ;;  %vm19_vm2 = vcmask 97344   ;;  %vm25_vm3 = vcmask 64544   ;;  %s55_s0 = inlined_call_operand.vmem [shape: f32[4,4], index: 0, kind: input, shape index: {}]   ;;  %s56_s1 = inlined_call_operand.vmem [shape: f32[1,16], index: 1, kind: output, shape index: {}]  }
   0x1   :  { %v4_v0 = vld [vmem:[%s55_s0] sm:$0xf]  ;;  %s36_s0 = smov 12  }
   0x2   :  { %5 = vst [vmem:[#allocation1] sm:$0xf] %v4_v0 }
   0x9   :  { %v10_v1 = vld [vmem:[#allocation1 + $0x3] sm:$0x1]   ;;  %v22_v2 = vld [vmem:[#allocation1 + $0x1] sm:$0x1]   ;;  %v16_v3 = vld [vmem:[#allocation1 + $0x2] sm:$0x1]  }
   0xa   :  { %11 = vrot.lane.b32.xlu0 %v10_v1, %s36_s0  ;;  %23 = vrot.lane.b32.xlu1 %v22_v2, %s37_s8  ;;  %v6_v4 = vld [vmem:[#allocation1] sm:$0x1]  }
   0xb   :  { %8 = vst.msk [vmem:[#allocation0] sm:$0x1] %vm7_vm0, %v6_v4  }
  0x12   :  { %17 = vrot.lane.b32.xlu0 %v16_v3, %s38_s9 }
  0x7c   :  { %v12_v5 = vpop.permute.xlu0 %11   ;;  %v24_v6 = vpop.permute.xlu1 %23  }
  0x7d   :  { %14 = vst.msk [vmem:[#allocation0] sm:$0x1] %vm13_vm1, %v12_v5  }
  0x84   :  { %v18_v7 = vpop.permute.xlu0 %17  }
  0x85   :  { %20 = vst.msk [vmem:[#allocation0] sm:$0x1] %vm19_vm2, %v18_v7  }
  0x86   :  { %26 = vst.msk [vmem:[#allocation0] sm:$0x1] %vm25_vm3, %v24_v6  }
  0x8d   :  { %v29_v8 = vld [vmem:[#allocation0] sm:$0x1] }
  0x8e   :  { %32 = vst [vmem:[%s56_s1] sm:$0x1] %v29_v8 }

// kernel: convt_bn_forward.2
= control target key start
LH: loop header
LB: loop body
LE: loop exit
PB: predicated region body
PF: predicated region fallthrough
CT: control target
= control target key end

     0   :  { %s844_s12 = smov 0   ;;  %s1059_s0 = inlined_call_operand.vmem [shape: bf16[512,72], index: 0, kind: input, shape index: {}]   ;;  %s1060_s1 = inlined_call_operand.vmem [shape: bf16[72,16], index: 1, kind: input, shape index: {}]   ;;  %s1061_s2 = inlined_call_operand.vmem [shape: f32[1,16], index: 2, kind: output, shape index: {0}]   ;;  %s1062_s3 = inlined_call_operand.vmem [shape: f32[1,16], index: 3, kind: output, shape index: {1}]  }
   0x1 LB: > { %s666_s13 = sadd.s32 4294967295, %s821_s12   ;;  %p669_p0 = scmp.ge.s32.totalorder %s821_s12, 1  ;;  %s821_s12 = sphi %s844_s12, %s14_s12  }
   0x2   : > { %p131_p1 = scmp.lt.s32.totalorder %s821_s12, 3 }
   0x4   : > { %p132_p2 = pnand %p669_p0, %p131_p1 }
   0x5   : > { %s670_s14 = sshll.u32 (!%p132_p2), %s666_s13, 5  ;;  %p672_p4 = scmp.ne.s32.totalorder (!%p132_p2), %s666_s13, 0 }
   0x6   : > { %135 = sbr.rel (%p132_p2) target bundleno = 294 (0x126), region = 28  ;;  %p151_p3 = scmp.lt.s32.totalorder (!%p132_p2), %s670_s14, 63 }
   0xb   : > { %s1064_s14 = smov (!%p151_p3, %s670_s14), 63  ;;  %160 = sbr.rel (%p672_p4) target bundleno = 19 (0x13), region = 32 }
   0xc   : > { %s671_s15 = sshll.u32 %s1064_s14, 2 }
   0xd   : > { %s855_s18 = scalar_lea.vmem %s1059_s0, %s671_s15 }
  0x10   : > { %vm161_vm0 = vcmask 122880   ;;  %v823_v0 = vmov 0.0  }
  0x11   : > { %162 = vst.msk [vmem:[%s1061_s2] sm:$0x1] %vm161_vm0, %v823_v0 }
  0x12   : > { %163 = vst.msk [vmem:[%s1062_s3] sm:$0x1] %vm161_vm0, %v823_v0 }
  0x13 PF: > { %v204_v1 = vld [vmem:[%s1060_s1 + $0x20] sm:$0xf]  ;;  %vm361_vm1 = vcmask 1043456   ;;  %v790_v5 = vld [vmem:[%s1060_s1 + $0x18] sm:$0xff]  ;;  %v789_v6 = vld [vmem:[%s1060_s1 + $0x10] sm:$0xff]  ;;  %vm312_vm2 = vcmask 588800  }
  0x14   : > { %v302_v2 = vunpack.c.l.b16 %v204_v1  ;;  %v788_v7 = vld [vmem:[%s1060_s1 + $0x8] sm:$0xff]  ;;  %v787_v8 = vld [vmem:[%s1060_s1] sm:$0xff]  ;;  %v773_v17 = vld [vmem:[%s855_s18 + $0x10] sm:$0xff]  ;;  %vm455_vm3 = vcmask 130048   ;;  %vm526_vm4 = vcmask 122880  }
  0x15   : > { %v771_v9 = vld [vmem:[%s855_s18] sm:$0xff]  ;;  %v772_v13 = vld [vmem:[%s855_s18 + $0x8] sm:$0xff]  ;;  %v777_v18 = vld [vmem:[%s855_s18 + $0x30] sm:$0xff] }
  0x16   : > { %v307_v3 = vpack.c.b16 %v302_v2, %v302_v2  ;;  %v775_v10 = vld [vmem:[%s855_s18 + $0x20] sm:$0xff]  ;;  %v776_v14 = vld [vmem:[%s855_s18 + $0x28] sm:$0xff]  ;;  %v781_v19 = vld [vmem:[%s855_s18 + $0x50] sm:$0xff] }
  0x17   : > { %v779_v11 = vld [vmem:[%s855_s18 + $0x40] sm:$0xff]  ;;  %v780_v15 = vld [vmem:[%s855_s18 + $0x48] sm:$0xff]  ;;  %v785_v20 = vld [vmem:[%s855_s18 + $0x70] sm:$0xff] }
  0x18   : > { %v363_v4 = vsel %vm361_vm1, %v307_v3, 0  ;;  %v783_v12 = vld [vmem:[%s855_s18 + $0x60] sm:$0xff]  ;;  %v784_v16 = vld [vmem:[%s855_s18 + $0x68] sm:$0xff]  ;;  %v774_v21 = vld [vmem:[%s855_s18 + $0x18] sm:$0xff] }
  0x19   : > { %368 = vmatpush.bf16.msra.mxu0 %v363_v4  ;;  %791 = vmatpush.bf16.msra.mxu1 %v363_v4  ;;  %v778_v22 = vld [vmem:[%s855_s18 + $0x38] sm:$0xff] }
  0x1a   : > { %792 = vmatpush.bf16.msra.mxu2 %v363_v4  ;;  %793 = vmatpush.bf16.msra.mxu3 %v363_v4  ;;  %v782_v23 = vld [vmem:[%s855_s18 + $0x58] sm:$0xff] }
  0x1b   : > { %v786_v24 = vld [vmem:[%s855_s18 + $0x78] sm:$0xff] }
  0x1d   : > { %369 = vmatpush.bf16.msra.mxu0 %v790_v5  ;;  %794 = vmatpush.bf16.msra.mxu1 %v790_v5 }
  0x1e   : > { %795 = vmatpush.bf16.msra.mxu2 %v790_v5  ;;  %796 = vmatpush.bf16.msra.mxu3 %v790_v5 }
  0x21   : > { %370 = vmatpush.bf16.msra.mxu0 %v789_v6  ;;  %797 = vmatpush.bf16.msra.mxu1 %v789_v6 }
  0x22   : > { %798 = vmatpush.bf16.msra.mxu2 %v789_v6  ;;  %799 = vmatpush.bf16.msra.mxu3 %v789_v6 }
  0x25   : > { %371 = vmatpush.bf16.msra.mxu0 %v788_v7  ;;  %800 = vmatpush.bf16.msra.mxu1 %v788_v7 }
  0x26   : > { %801 = vmatpush.bf16.msra.mxu2 %v788_v7  ;;  %802 = vmatpush.bf16.msra.mxu3 %v788_v7 }
  0x29   : > { %372 = vmatpush.bf16.msra.mxu0 %v787_v8  ;;  %803 = vmatpush.bf16.msra.mxu1 %v787_v8 }
  0x2a   : > { %804 = vmatpush.bf16.msra.mxu2 %v787_v8  ;;  %805 = vmatpush.bf16.msra.mxu3 %v787_v8 }
  0x2c   : > { %753 = vmatmul.msk.bf16.vlgmr.msra.gmra.mxu0 %vm312_vm2, %v771_v9  ;;  %757 = vmatmul.msk.bf16.vlgmr.msra.gmra.mxu1 %vm312_vm2, %v775_v10 }
  0x2d   : > { %761 = vmatmul.msk.bf16.vlgmr.msra.gmra.mxu2 %vm312_vm2, %v779_v11  ;;  %765 = vmatmul.msk.bf16.vlgmr.msra.gmra.mxu3 %vm312_vm2, %v783_v12 }
  0x3c   : > { %754 = vmatmul.msk.bf16.gmra.mxu0 %vm312_vm2, %v772_v13  ;;  %758 = vmatmul.msk.bf16.gmra.mxu1 %vm312_vm2, %v776_v14 }
  0x3d   : > { %762 = vmatmul.msk.bf16.gmra.mxu2 %vm312_vm2, %v780_v15  ;;  %766 = vmatmul.msk.bf16.gmra.mxu3 %vm312_vm2, %v784_v16 }
  0x4c   : > { %755 = vmatmul.msk.bf16.gmra.mxu0 %vm312_vm2, %v773_v17  ;;  %759 = vmatmul.msk.bf16.gmra.mxu1 %vm312_vm2, %v777_v18 }
  0x4d   : > { %763 = vmatmul.msk.bf16.gmra.mxu2 %vm312_vm2, %v781_v19  ;;  %767 = vmatmul.msk.bf16.gmra.mxu3 %vm312_vm2, %v785_v20 }
  0x5c   : > { %756 = vmatmul.msk.bf16.gmra.mxu0 %vm312_vm2, %v774_v21  ;;  %760 = vmatmul.msk.bf16.gmra.mxu1 %vm312_vm2, %v778_v22 }
  0x5d   : > { %764 = vmatmul.msk.bf16.gmra.mxu2 %vm312_vm2, %v782_v23  ;;  %768 = vmatmul.msk.bf16.gmra.mxu3 %vm312_vm2, %v786_v24 }
  0xa9   : > { %v374_v25 = vpop.f32.mrf.mxu0  ;;  %v394_v26 = vpop.f32.mrf.mxu1 }
  0xaa   : > { %v529_v42 = vmul.f32 %v374_v25, %v374_v25  ;;  %v456_v46 = vsel %vm455_vm3, %v374_v25, 0.0  ;;  %v537_v15 = vmul.f32 %v394_v26, %v394_v26  ;;  %v471_v21 = vsel %vm455_vm3, %v394_v26, 0.0 }
  0xac   : > { %v561_v51 = vsel %vm455_vm3, %v529_v42, 0.0 }
  0xb0   : > { %v912_v29 = vpop.f32.mrf.mxu2  ;;  %v920_v35 = vpop.f32.mrf.mxu3 }
  0xb1   : > { %v376_v27 = vpop.f32.mrf.mxu0  ;;  %v910_v28 = vpop.f32.mrf.mxu1 }
  0xb2   : > { %v530_v41 = vmul.f32 %v376_v27, %v376_v27  ;;  %v457_v43 = vsel %vm455_vm3, %v376_v27, 0.0  ;;  %v538_v22 = vmul.f32 %v910_v28, %v910_v28 }
  0xb3   : > { %v458_v50 = vadd.f32 %v457_v43, %v456_v46 }
  0xb4   : > { %v562_v47 = vsel %vm455_vm3, %v530_v41, 0.0  ;;  %v578_v26 = vsel %vm455_vm3, %v538_v22, 0.0 }
  0xb5   : > { %v563_v55 = vadd.f32 %v562_v47, %v561_v51 }
  0xb8   : > { %v916_v33 = vpop.f32.mrf.mxu2  ;;  %v926_v40 = vpop.f32.mrf.mxu3 }
  0xb9   : > { %v379_v30 = vpop.f32.mrf.mxu0  ;;  %v914_v31 = vpop.f32.mrf.mxu1 }
  0xba   : > { %v531_v44 = vmul.f32 %v379_v30, %v379_v30  ;;  %v459_v48 = vsel %vm455_vm3, %v379_v30, 0.0  ;;  %v576_v30 = vsel %vm455_vm3, %v537_v15, 0.0  ;;  %v475_v42 = vsel %vm455_vm3, %v914_v31, 0.0 }
  0xbb   : > { %v460_v56 = vadd.f32 %v459_v48, %v458_v50 }
  0xbc   : > { %v564_v52 = vsel %vm455_vm3, %v531_v44, 0.0 }
  0xbd   : > { %v565_v62 = vadd.f32 %v564_v52, %v563_v55 }
  0xc0   : > { %v922_v37 = vpop.f32.mrf.mxu2  ;;  %v939_v0 = vpop.f32.mrf.mxu3 }
  0xc1   : > { %v381_v32 = vpop.f32.mrf.mxu0  ;;  %v918_v34 = vpop.f32.mrf.mxu1 }
  0xc2   : > { %v532_v49 = vmul.f32 %v381_v32, %v381_v32  ;;  %v461_v53 = vsel %vm455_vm3, %v381_v32, 0.0  ;;  %v473_v32 = vsel %vm455_vm3, %v910_v28, 0.0  ;;  %v540_v43 = vmul.f32 %v918_v34, %v918_v34 }
  0xc3   : > { %v462_v63 = vadd.f32 %v461_v53, %v460_v56  ;;  %v477_v28 = vsel %vm455_vm3, %v918_v34, 0.0 }
  0xc4   : > { %v566_v59 = vsel %vm455_vm3, %v532_v49, 0.0  ;;  %v582_v52 = vsel %vm455_vm3, %v540_v43, 0.0 }
  0xc5   : > { %v567_v4 = vadd.f32 %v566_v59, %v565_v62 }
  0xc8   : > { %v929_v45 = vpop.f32.mrf.mxu2  ;;  %v953_v27 = vpop.f32.mrf.mxu3 }
  0xc9   : > { %v384_v36 = vpop.f32.mrf.mxu0  ;;  %v924_v38 = vpop.f32.mrf.mxu1 }
  0xca   : > { %v533_v54 = vmul.f32 %v384_v36, %v384_v36  ;;  %v463_v60 = vsel %vm455_vm3, %v384_v36, 0.0  ;;  %v539_v36 = vmul.f32 %v914_v31, %v914_v31  ;;  %v541_v49 = vmul.f32 %v924_v38, %v924_v38 }
  0xcb   : > { %v464_v5 = vadd.f32 %v463_v60, %v462_v63  ;;  %v479_v31 = vsel %vm455_vm3, %v924_v38, 0.0 }
  0xcc   : > { %v568_v1 = vsel %vm455_vm3, %v533_v54, 0.0  ;;  %v580_v48 = vsel %vm455_vm3, %v539_v36, 0.0 }
  0xcd   : > { %v569_v8 = vadd.f32 %v568_v1, %v567_v4  ;;  %v545_v4 = vmul.f32 %v912_v29, %v912_v29 }
  0xcf   : > { %v592_v15 = vsel %vm455_vm3, %v545_v4, 0.0 }
  0xd0   : > { %v945_v10 = vpop.f32.mrf.mxu2  ;;  %v975_v62 = vpop.f32.mrf.mxu3 }
  0xd1   : > { %v386_v39 = vpop.f32.mrf.mxu0  ;;  %v406_v58 = vpop.f32.mrf.mxu1 }
  0xd2   : > { %v534_v61 = vmul.f32 %v386_v39, %v386_v39  ;;  %v465_v2 = vsel %vm455_vm3, %v386_v39, 0.0  ;;  %v542_v53 = vmul.f32 %v406_v58, %v406_v58  ;;  %v481_v59 = vsel %vm455_vm3, %v406_v58, 0.0 }
  0xd3   : > { %v466_v9 = vadd.f32 %v465_v2, %v464_v5 }
  0xd4   : > { %v570_v6 = vsel %vm455_vm3, %v534_v61, 0.0  ;;  %v586_v63 = vsel %vm455_vm3, %v542_v53, 0.0 }
  0xd5   : > { %v571_v12 = vadd.f32 %v570_v6, %v569_v8 }
  0xd8   : > { %v426_v47 = vpop.f32.mrf.mxu2 }
  0xd9   : > { %v389_v57 = vpop.f32.mrf.mxu0  ;;  %v409_v20 = vpop.f32.mrf.mxu1 }
  0xda   : > { %v535_v3 = vmul.f32 %v389_v57, %v389_v57  ;;  %v467_v7 = vsel %vm455_vm3, %v389_v57, 0.0  ;;  %v584_v57 = vsel %vm455_vm3, %v541_v49, 0.0  ;;  %v543_v60 = vmul.f32 %v409_v20, %v409_v20 }
  0xdb   : > { %v468_v13 = vadd.f32 %v467_v7, %v466_v9  ;;  %v483_v1 = vsel %vm455_vm3, %v409_v20, 0.0  ;;  %v487_v9 = vsel %vm455_vm3, %v912_v29, 0.0  ;;  %v491_v29 = vsel %vm455_vm3, %v922_v37, 0.0 }
  0xdc   : > { %v572_v11 = vsel %vm455_vm3, %v535_v3, 0.0  ;;  %v588_v5 = vsel %vm455_vm3, %v543_v60, 0.0 }
  0xdd   : > { %v573_v18 = vadd.f32 %v572_v11, %v571_v12  ;;  %v546_v11 = vmul.f32 %v916_v33, %v916_v33 }
  0xdf   : > { %v594_v20 = vsel %vm455_vm3, %v546_v11, 0.0 }
  0xe0   : > { %v429_v8 = vpop.f32.mrf.mxu2 }
  0xe1   : > { %v391_v14 = vpop.f32.mrf.mxu0  ;;  %v411_v56 = vpop.f32.mrf.mxu1 }
  0xe2   : > { %v469_v16 = vsel %vm455_vm3, %v391_v14, 0.0  ;;  %v536_v17 = vmul.f32 %v391_v14, %v391_v14  ;;  %v544_v2 = vmul.f32 %v411_v56, %v411_v56  ;;  %v485_v6 = vsel %vm455_vm3, %v411_v56, 0.0 }
  0xe3   : > { %v470_v19 = vadd.f32 %v469_v16, %v468_v13  ;;  %v489_v16 = vsel %vm455_vm3, %v916_v33, 0.0  ;;  %v493_v33 = vsel %vm455_vm3, %v929_v45, 0.0 }
  0xe4   : > { %v574_v23 = vsel %vm455_vm3, %v536_v17, 0.0  ;;  %v590_v12 = vsel %vm455_vm3, %v544_v2, 0.0  ;;  %v547_v17 = vmul.f32 %v922_v37, %v922_v37  ;;  %v495_v37 = vsel %vm455_vm3, %v945_v10, 0.0 }
  0xe5   : > { %v472_v24 = vadd.f32 %v471_v21, %v470_v19  ;;  %v575_v25 = vadd.f32 %v574_v23, %v573_v18  ;;  %v548_v21 = vmul.f32 %v929_v45, %v929_v45  ;;  %v555_v2 = vmul.f32 %v939_v0, %v939_v0 }
  0xe7   : > { %v474_v39 = vadd.f32 %v473_v32, %v472_v24  ;;  %v577_v41 = vadd.f32 %v576_v30, %v575_v25  ;;  %v446_v24 = vpop.f32.mrf.mxu3  ;;  %v596_v25 = vsel %vm455_vm3, %v547_v17, 0.0  ;;  %v549_v30 = vmul.f32 %v945_v10, %v945_v10 }
  0xe8   : > { %v431_v43 = vpop.f32.mrf.mxu2  ;;  %v553_v10 = vmul.f32 %v920_v35, %v920_v35 }
  0xe9   : > { %v476_v44 = vadd.f32 %v475_v42, %v474_v39  ;;  %v579_v46 = vadd.f32 %v578_v26, %v577_v41  ;;  %v598_v39 = vsel %vm455_vm3, %v548_v21, 0.0  ;;  %v550_v41 = vmul.f32 %v426_v47, %v426_v47 }
  0xeb   : > { %v581_v50 = vadd.f32 %v580_v48, %v579_v46  ;;  %v478_v51 = vadd.f32 %v477_v28, %v476_v44  ;;  %v600_v44 = vsel %vm455_vm3, %v549_v30, 0.0  ;;  %v497_v46 = vsel %vm455_vm3, %v426_v47, 0.0 }
  0xec   : > { %v551_v48 = vmul.f32 %v429_v8, %v429_v8  ;;  %v602_v49 = vsel %vm455_vm3, %v550_v41, 0.0 }
  0xed   : > { %v480_v54 = vadd.f32 %v479_v31, %v478_v51  ;;  %v583_v55 = vadd.f32 %v582_v52, %v581_v50  ;;  %v499_v50 = vsel %vm455_vm3, %v429_v8, 0.0  ;;  %v552_v51 = vmul.f32 %v431_v43, %v431_v43 }
  0xee   : > { %v604_v53 = vsel %vm455_vm3, %v551_v48, 0.0  ;;  %v557_v8 = vmul.f32 %v975_v62, %v975_v62 }
  0xef   : > { %v482_v34 = vadd.f32 %v481_v59, %v480_v54  ;;  %v585_v61 = vadd.f32 %v584_v57, %v583_v55  ;;  %v501_v54 = vsel %vm455_vm3, %v431_v43, 0.0  ;;  %v449_v47 = vpop.f32.mrf.mxu3  ;;  %v503_v57 = vsel %vm455_vm3, %v920_v35, 0.0 }
  0xf0   : > { %v554_v59 = vmul.f32 %v926_v40, %v926_v40  ;;  %v606_v60 = vsel %vm455_vm3, %v552_v51, 0.0  ;;  %v507_v35 = vsel %vm455_vm3, %v939_v0, 0.0  ;;  %v511_v0 = vsel %vm455_vm3, %v975_v62, 0.0 }
  0xf1   : > { %v484_v3 = vadd.f32 %v483_v1, %v482_v34  ;;  %v587_v38 = vadd.f32 %v586_v63, %v585_v61  ;;  %v608_v63 = vsel %vm455_vm3, %v553_v10, 0.0  ;;  %v505_v1 = vsel %vm455_vm3, %v926_v40, 0.0 }
  0xf2   : > { %v610_v4 = vsel %vm455_vm3, %v554_v59, 0.0  ;;  %v509_v40 = vsel %vm455_vm3, %v953_v27, 0.0  ;;  %v616_v17 = vsel %vm455_vm3, %v557_v8, 0.0  ;;  %v515_v21 = vsel %vm455_vm3, %v449_v47, 0.0 }
  0xf3   : > { %v589_v58 = vadd.f32 %v588_v5, %v587_v38  ;;  %v486_v7 = vadd.f32 %v485_v6, %v484_v3  ;;  %v556_v5 = vmul.f32 %v953_v27, %v953_v27 }
  0xf5   : > { %v488_v13 = vadd.f32 %v487_v9, %v486_v7  ;;  %v591_v14 = vadd.f32 %v590_v12, %v589_v58  ;;  %v612_v7 = vsel %vm455_vm3, %v555_v2, 0.0  ;;  %v614_v12 = vsel %vm455_vm3, %v556_v5, 0.0 }
  0xf7   : > { %v490_v18 = vadd.f32 %v489_v16, %v488_v13  ;;  %v593_v19 = vadd.f32 %v592_v15, %v591_v14  ;;  %v558_v13 = vmul.f32 %v446_v24, %v446_v24  ;;  %v451_v16 = vpop.f32.mrf.mxu3 }
  0xf9   : > { %v492_v22 = vadd.f32 %v491_v29, %v490_v18  ;;  %v595_v23 = vadd.f32 %v594_v20, %v593_v19  ;;  %v513_v18 = vsel %vm455_vm3, %v446_v24, 0.0  ;;  %v559_v19 = vmul.f32 %v449_v47, %v449_v47 }
  0xfa   : > { %v618_v29 = vsel %vm455_vm3, %v558_v13, 0.0 }
  0xfb   : > { %v597_v32 = vadd.f32 %v596_v25, %v595_v23  ;;  %v494_v36 = vadd.f32 %v493_v33, %v492_v22  ;;  %v560_v22 = vmul.f32 %v451_v16, %v451_v16  ;;  %v620_v62 = vsel %vm455_vm3, %v559_v19, 0.0 }
  0xfc   : > { %v517_v33 = vsel %vm455_vm3, %v451_v16, 0.0 }
  0xfd   : > { %v496_v26 = vadd.f32 %v495_v37, %v494_v36  ;;  %v599_v42 = vadd.f32 %v598_v39, %v597_v32  ;;  %v622_v36 = vsel %vm455_vm3, %v560_v22, 0.0 }
  0xff   : > { %v498_v45 = vadd.f32 %v497_v46, %v496_v26  ;;  %v601_v28 = vadd.f32 %v600_v44, %v599_v42 }
 0x101   : > { %v603_v52 = vadd.f32 %v602_v49, %v601_v28  ;;  %v500_v31 = vadd.f32 %v499_v50, %v498_v45  ;;  %v454_v45 = vld [vmem:[%s1061_s2] sm:$0x1] }
 0x102   : > { %v528_v50 = vld [vmem:[%s1062_s3] sm:$0x1] }
 0x103   : > { %v605_v55 = vadd.f32 %v604_v53, %v603_v52  ;;  %v502_v56 = vadd.f32 %v501_v54, %v500_v31 }
 0x105   : > { %v504_v34 = vadd.f32 %v503_v57, %v502_v56  ;;  %v607_v61 = vadd.f32 %v606_v60, %v605_v55 }
 0x107   : > { %v506_v3 = vadd.f32 %v505_v1, %v504_v34  ;;  %v609_v38 = vadd.f32 %v608_v63, %v607_v61 }
 0x109   : > { %v508_v6 = vadd.f32 %v507_v35, %v506_v3  ;;  %v611_v58 = vadd.f32 %v610_v4, %v609_v38 }
 0x10b   : > { %v613_v9 = vadd.f32 %v612_v7, %v611_v58  ;;  %v510_v11 = vadd.f32 %v509_v40, %v508_v6 }
 0x10d   : > { %v512_v14 = vadd.f32 %v511_v0, %v510_v11  ;;  %v615_v15 = vadd.f32 %v614_v12, %v613_v9 }
 0x10f   : > { %v514_v27 = vadd.f32 %v513_v18, %v512_v14  ;;  %v617_v20 = vadd.f32 %v616_v17, %v615_v15 }
 0x111   : > { %v619_v23 = vadd.f32 %v618_v29, %v617_v20  ;;  %v516_v25 = vadd.f32 %v515_v21, %v514_v27 }
 0x113   : > { %v621_v30 = vadd.f32 %v620_v62, %v619_v23  ;;  %v518_v32 = vadd.f32 %v517_v33, %v516_v25 }
 0x115   : > { %v519_v39 = vrot.slane %v518_v32, 4  ;;  %v623_v24 = vadd.f32 %v622_v36, %v621_v30 }
 0x117   : > { %v520_v37 = vadd.f32 %v519_v39, %v518_v32  ;;  %v624_v41 = vrot.slane %v623_v24, 4 }
 0x119   : > { %v521_v26 = vrot.slane %v520_v37, 2  ;;  %v625_v42 = vadd.f32 %v624_v41, %v623_v24 }
 0x11b   : > { %v522_v43 = vadd.f32 %v521_v26, %v520_v37  ;;  %v626_v44 = vrot.slane %v625_v42, 2 }
 0x11d   : > { %v523_v46 = vrot.slane %v522_v43, 1  ;;  %v627_v48 = vadd.f32 %v626_v44, %v625_v42 }
 0x11f   : > { %v524_v28 = vadd.f32 %v523_v46, %v522_v43  ;;  %v628_v49 = vrot.slane %v627_v48, 1 }
 0x121   : > { %v525_v51 = vadd.f32 %v524_v28, %v454_v45  ;;  %v629_v52 = vadd.f32 %v628_v49, %v627_v48 }
 0x123   : > { %527 = vst.msk [vmem:[%s1061_s2] sm:$0x1] %vm526_vm4, %v525_v51  ;;  %v630_v31 = vadd.f32 %v629_v52, %v528_v50 }
 0x125   : > { %631 = vst.msk [vmem:[%s1062_s3] sm:$0x1] %vm526_vm4, %v630_v31 }
 0x126 PF: > { %s14_s12 = sadd.s32 1, %s821_s12  }
 0x127   : > { %p11_p5 = scmp.ge.s32.totalorder %s14_s12, 4  }
 0x129   :  { %13 = sbr.rel (!%p11_p5) target bundleno = 1 (0x1), region = 66 }

// kernel: convt_bn_forward.3
= control target key start
LH: loop header
LB: loop body
LE: loop exit
PB: predicated region body
PF: predicated region fallthrough
CT: control target
= control target key end

     0   :  { %s802_s12 = smov 0   ;;  %s1012_s0 = inlined_call_operand.vmem [shape: bf16[512,72], index: 0, kind: input, shape index: {}]   ;;  %s1013_s1 = inlined_call_operand.vmem [shape: bf16[72,16], index: 1, kind: input, shape index: {}]   ;;  %s1014_s2 = inlined_call_operand.vmem [shape: f32[2,16], index: 2, kind: input, shape index: {}]   ;;  %s1015_s3 = inlined_call_operand.vmem [shape: f32[512,16], index: 3, kind: output, shape index: {}]  }
   0x1 LB: > { %s622_s13 = sadd.s32 4294967295, %s780_s12   ;;  %p626_p0 = scmp.ge.s32.totalorder %s780_s12, 1  ;;  %s780_s12 = sphi %s802_s12, %s13_s12  }
   0x2   : > { %p138_p1 = scmp.lt.s32.totalorder %s780_s12, 3 }
   0x4   : > { %p139_p2 = pnand %p626_p0, %p138_p1 }
   0x5   : > { %s627_s16 = sshll.u32 (!%p139_p2), %s622_s13, 5 }
   0x6   : > { %142 = sbr.rel (%p139_p2) target bundleno = 231 (0xe7), region = 32  ;;  %p163_p3 = scmp.lt.s32.totalorder (!%p139_p2), %s627_s16, 63 }
   0xb   : > { %v215_v0 = vld [vmem:[%s1013_s1 + $0x20] sm:$0xf]  ;;  %vm372_vm0 = vcmask 1043456   ;;  %v748_v4 = vld [vmem:[%s1013_s1 + $0x18] sm:$0xff]  ;;  %v747_v5 = vld [vmem:[%s1013_s1 + $0x10] sm:$0xff]  ;;  %s1017_s16 = smov (!%p163_p3, %s627_s16), 63 }
   0xc   : > { %v313_v1 = vunpack.c.l.b16 %v215_v0  ;;  %v746_v6 = vld [vmem:[%s1013_s1 + $0x8] sm:$0xff]  ;;  %s628_s23 = sshll.u32 %s1017_s16, 2  ;;  %v745_v7 = vld [vmem:[%s1013_s1] sm:$0xff]  ;;  %vm323_vm1 = vcmask 588800   ;;  %s630_s4 = sshll.u32 %s1017_s16, 3  ;;  %vm533_vm2 = vcmask 130048  }
   0xd   : > { %s831_s28 = scalar_lea.vmem %s1012_s0, %s628_s23  ;;  %v868_v24 = vld [vmem:[%s1014_s2] ss:$0 sm:$0xff]  ;;  %v874_v25 = vld [vmem:[%s1014_s2 + $0x1] ss:$0 sm:$0xff]  ;;  %s881_s9 = scalar_lea.vmem %s1015_s3, %s630_s4 }
   0xe   : > { %v318_v2 = vpack.c.b16 %v313_v1, %v313_v1  ;;  %v729_v8 = vld [vmem:[%s831_s28] sm:$0xff]  ;;  %v730_v12 = vld [vmem:[%s831_s28 + $0x8] sm:$0xff]  ;;  %v731_v16 = vld [vmem:[%s831_s28 + $0x10] sm:$0xff] }
   0xf   : > { %v733_v9 = vld [vmem:[%s831_s28 + $0x20] sm:$0xff]  ;;  %v734_v13 = vld [vmem:[%s831_s28 + $0x28] sm:$0xff]  ;;  %v735_v17 = vld [vmem:[%s831_s28 + $0x30] sm:$0xff] }
  0x10   : > { %v374_v3 = vsel %vm372_vm0, %v318_v2, 0  ;;  %v737_v10 = vld [vmem:[%s831_s28 + $0x40] sm:$0xff]  ;;  %v738_v14 = vld [vmem:[%s831_s28 + $0x48] sm:$0xff]  ;;  %v739_v18 = vld [vmem:[%s831_s28 + $0x50] sm:$0xff] }
  0x11   : > { %379 = vmatpush.bf16.msra.mxu0 %v374_v3  ;;  %749 = vmatpush.bf16.msra.mxu1 %v374_v3  ;;  %v741_v11 = vld [vmem:[%s831_s28 + $0x60] sm:$0xff]  ;;  %v742_v15 = vld [vmem:[%s831_s28 + $0x68] sm:$0xff]  ;;  %v743_v19 = vld [vmem:[%s831_s28 + $0x70] sm:$0xff] }
  0x12   : > { %750 = vmatpush.bf16.msra.mxu2 %v374_v3  ;;  %751 = vmatpush.bf16.msra.mxu3 %v374_v3  ;;  %v732_v20 = vld [vmem:[%s831_s28 + $0x18] sm:$0xff] }
  0x13   : > { %v736_v21 = vld [vmem:[%s831_s28 + $0x38] sm:$0xff] }
  0x14   : > { %v740_v22 = vld [vmem:[%s831_s28 + $0x58] sm:$0xff] }
  0x15   : > { %380 = vmatpush.bf16.msra.mxu0 %v748_v4  ;;  %752 = vmatpush.bf16.msra.mxu1 %v748_v4  ;;  %v744_v23 = vld [vmem:[%s831_s28 + $0x78] sm:$0xff] }
  0x16   : > { %753 = vmatpush.bf16.msra.mxu2 %v748_v4  ;;  %754 = vmatpush.bf16.msra.mxu3 %v748_v4 }
  0x19   : > { %381 = vmatpush.bf16.msra.mxu0 %v747_v5  ;;  %755 = vmatpush.bf16.msra.mxu1 %v747_v5 }
  0x1a   : > { %756 = vmatpush.bf16.msra.mxu2 %v747_v5  ;;  %757 = vmatpush.bf16.msra.mxu3 %v747_v5 }
  0x1d   : > { %382 = vmatpush.bf16.msra.mxu0 %v746_v6  ;;  %758 = vmatpush.bf16.msra.mxu1 %v746_v6 }
  0x1e   : > { %759 = vmatpush.bf16.msra.mxu2 %v746_v6  ;;  %760 = vmatpush.bf16.msra.mxu3 %v746_v6 }
  0x21   : > { %383 = vmatpush.bf16.msra.mxu0 %v745_v7  ;;  %761 = vmatpush.bf16.msra.mxu1 %v745_v7 }
  0x22   : > { %762 = vmatpush.bf16.msra.mxu2 %v745_v7  ;;  %763 = vmatpush.bf16.msra.mxu3 %v745_v7 }
  0x24   : > { %711 = vmatmul.msk.bf16.vlgmr.msra.gmra.mxu0 %vm323_vm1, %v729_v8  ;;  %715 = vmatmul.msk.bf16.vlgmr.msra.gmra.mxu1 %vm323_vm1, %v733_v9 }
  0x25   : > { %719 = vmatmul.msk.bf16.vlgmr.msra.gmra.mxu2 %vm323_vm1, %v737_v10  ;;  %723 = vmatmul.msk.bf16.vlgmr.msra.gmra.mxu3 %vm323_vm1, %v741_v11 }
  0x34   : > { %712 = vmatmul.msk.bf16.gmra.mxu0 %vm323_vm1, %v730_v12  ;;  %716 = vmatmul.msk.bf16.gmra.mxu1 %vm323_vm1, %v734_v13 }
  0x35   : > { %720 = vmatmul.msk.bf16.gmra.mxu2 %vm323_vm1, %v738_v14  ;;  %724 = vmatmul.msk.bf16.gmra.mxu3 %vm323_vm1, %v742_v15 }
  0x44   : > { %713 = vmatmul.msk.bf16.gmra.mxu0 %vm323_vm1, %v731_v16  ;;  %717 = vmatmul.msk.bf16.gmra.mxu1 %vm323_vm1, %v735_v17 }
  0x45   : > { %721 = vmatmul.msk.bf16.gmra.mxu2 %vm323_vm1, %v739_v18  ;;  %725 = vmatmul.msk.bf16.gmra.mxu3 %vm323_vm1, %v743_v19 }
  0x54   : > { %714 = vmatmul.msk.bf16.gmra.mxu0 %vm323_vm1, %v732_v20  ;;  %718 = vmatmul.msk.bf16.gmra.mxu1 %vm323_vm1, %v736_v21 }
  0x55   : > { %722 = vmatmul.msk.bf16.gmra.mxu2 %vm323_vm1, %v740_v22  ;;  %726 = vmatmul.msk.bf16.gmra.mxu3 %vm323_vm1, %v744_v23 }
  0xa1   : > { %v385_v26 = vpop.f32.mrf.mxu0  ;;  %v405_v27 = vpop.f32.mrf.mxu1 }
  0xa2   : > { %v468_v28 = vmul.f32 %v868_v24, %v385_v26  ;;  %v476_v29 = vmul.f32 %v868_v24, %v405_v27 }
  0xa4   : > { %v501_v30 = vadd.f32 %v874_v25, %v468_v28  ;;  %v509_v31 = vadd.f32 %v874_v25, %v476_v29 }
  0xa6   : > { %534 = vst.msk [vmem:[%s881_s9] sm:$0xff] %vm533_vm2, %v501_v30 }
  0xa7   : > { %542 = vst.msk [vmem:[%s881_s9 + $0x40] sm:$0xff] %vm533_vm2, %v509_v31 }
  0xa8   : > { %v425_v32 = vpop.f32.mrf.mxu2  ;;  %v445_v33 = vpop.f32.mrf.mxu3 }
  0xa9   : > { %v484_v34 = vmul.f32 %v868_v24, %v425_v32  ;;  %v492_v35 = vmul.f32 %v868_v24, %v445_v33  ;;  %v387_v36 = vpop.f32.mrf.mxu0  ;;  %v407_v37 = vpop.f32.mrf.mxu1 }
  0xaa   : > { %v469_v38 = vmul.f32 %v868_v24, %v387_v36  ;;  %v477_v39 = vmul.f32 %v868_v24, %v407_v37 }
  0xab   : > { %v517_v40 = vadd.f32 %v874_v25, %v484_v34  ;;  %v525_v41 = vadd.f32 %v874_v25, %v492_v35 }
  0xac   : > { %v502_v42 = vadd.f32 %v874_v25, %v469_v38  ;;  %v510_v43 = vadd.f32 %v874_v25, %v477_v39 }
  0xad   : > { %550 = vst.msk [vmem:[%s881_s9 + $0x80] sm:$0xff] %vm533_vm2, %v517_v40 }
  0xae   : > { %558 = vst.msk [vmem:[%s881_s9 + $0xc0] sm:$0xff] %vm533_vm2, %v525_v41 }
  0xaf   : > { %535 = vst.msk [vmem:[%s881_s9 + $0x8] sm:$0xff] %vm533_vm2, %v502_v42 }
  0xb0   : > { %543 = vst.msk [vmem:[%s881_s9 + $0x48] sm:$0xff] %vm533_vm2, %v510_v43  ;;  %v427_v44 = vpop.f32.mrf.mxu2  ;;  %v447_v45 = vpop.f32.mrf.mxu3 }
  0xb1   : > { %v485_v46 = vmul.f32 %v868_v24, %v427_v44  ;;  %v493_v47 = vmul.f32 %v868_v24, %v447_v45  ;;  %v390_v48 = vpop.f32.mrf.mxu0  ;;  %v410_v49 = vpop.f32.mrf.mxu1 }
  0xb2   : > { %v470_v50 = vmul.f32 %v868_v24, %v390_v48  ;;  %v478_v51 = vmul.f32 %v868_v24, %v410_v49 }
  0xb3   : > { %v518_v52 = vadd.f32 %v874_v25, %v485_v46  ;;  %v526_v53 = vadd.f32 %v874_v25, %v493_v47 }
  0xb4   : > { %v503_v54 = vadd.f32 %v874_v25, %v470_v50  ;;  %v511_v55 = vadd.f32 %v874_v25, %v478_v51 }
  0xb5   : > { %551 = vst.msk [vmem:[%s881_s9 + $0x88] sm:$0xff] %vm533_vm2, %v518_v52 }
  0xb6   : > { %559 = vst.msk [vmem:[%s881_s9 + $0xc8] sm:$0xff] %vm533_vm2, %v526_v53 }
  0xb7   : > { %536 = vst.msk [vmem:[%s881_s9 + $0x10] sm:$0xff] %vm533_vm2, %v503_v54 }
  0xb8   : > { %544 = vst.msk [vmem:[%s881_s9 + $0x50] sm:$0xff] %vm533_vm2, %v511_v55  ;;  %v430_v56 = vpop.f32.mrf.mxu2  ;;  %v450_v57 = vpop.f32.mrf.mxu3 }
  0xb9   : > { %v486_v58 = vmul.f32 %v868_v24, %v430_v56  ;;  %v494_v59 = vmul.f32 %v868_v24, %v450_v57  ;;  %v392_v60 = vpop.f32.mrf.mxu0  ;;  %v412_v61 = vpop.f32.mrf.mxu1 }
  0xba   : > { %v471_v62 = vmul.f32 %v868_v24, %v392_v60  ;;  %v479_v63 = vmul.f32 %v868_v24, %v412_v61 }
  0xbb   : > { %v519_v0 = vadd.f32 %v874_v25, %v486_v58  ;;  %v527_v1 = vadd.f32 %v874_v25, %v494_v59 }
  0xbc   : > { %v504_v2 = vadd.f32 %v874_v25, %v471_v62  ;;  %v512_v3 = vadd.f32 %v874_v25, %v479_v63 }
  0xbd   : > { %552 = vst.msk [vmem:[%s881_s9 + $0x90] sm:$0xff] %vm533_vm2, %v519_v0 }
  0xbe   : > { %560 = vst.msk [vmem:[%s881_s9 + $0xd0] sm:$0xff] %vm533_vm2, %v527_v1 }
  0xbf   : > { %537 = vst.msk [vmem:[%s881_s9 + $0x18] sm:$0xff] %vm533_vm2, %v504_v2 }
  0xc0   : > { %545 = vst.msk [vmem:[%s881_s9 + $0x58] sm:$0xff] %vm533_vm2, %v512_v3  ;;  %v432_v4 = vpop.f32.mrf.mxu2  ;;  %v452_v5 = vpop.f32.mrf.mxu3 }
  0xc1   : > { %v487_v6 = vmul.f32 %v868_v24, %v432_v4  ;;  %v495_v7 = vmul.f32 %v868_v24, %v452_v5  ;;  %v395_v8 = vpop.f32.mrf.mxu0  ;;  %v415_v9 = vpop.f32.mrf.mxu1 }
  0xc2   : > { %v472_v10 = vmul.f32 %v868_v24, %v395_v8  ;;  %v480_v11 = vmul.f32 %v868_v24, %v415_v9 }
  0xc3   : > { %v520_v12 = vadd.f32 %v874_v25, %v487_v6  ;;  %v528_v13 = vadd.f32 %v874_v25, %v495_v7 }
  0xc4   : > { %v505_v14 = vadd.f32 %v874_v25, %v472_v10  ;;  %v513_v15 = vadd.f32 %v874_v25, %v480_v11 }
  0xc5   : > { %553 = vst.msk [vmem:[%s881_s9 + $0x98] sm:$0xff] %vm533_vm2, %v520_v12 }
  0xc6   : > { %561 = vst.msk [vmem:[%s881_s9 + $0xd8] sm:$0xff] %vm533_vm2, %v528_v13 }
  0xc7   : > { %538 = vst.msk [vmem:[%s881_s9 + $0x20] sm:$0xff] %vm533_vm2, %v505_v14 }
  0xc8   : > { %546 = vst.msk [vmem:[%s881_s9 + $0x60] sm:$0xff] %vm533_vm2, %v513_v15  ;;  %v435_v16 = vpop.f32.mrf.mxu2  ;;  %v455_v17 = vpop.f32.mrf.mxu3 }
  0xc9   : > { %v488_v18 = vmul.f32 %v868_v24, %v435_v16  ;;  %v496_v19 = vmul.f32 %v868_v24, %v455_v17  ;;  %v397_v20 = vpop.f32.mrf.mxu0  ;;  %v417_v21 = vpop.f32.mrf.mxu1 }
  0xca   : > { %v473_v22 = vmul.f32 %v868_v24, %v397_v20  ;;  %v481_v23 = vmul.f32 %v868_v24, %v417_v21 }
  0xcb   : > { %v521_v26 = vadd.f32 %v874_v25, %v488_v18  ;;  %v529_v27 = vadd.f32 %v874_v25, %v496_v19 }
  0xcc   : > { %v506_v28 = vadd.f32 %v874_v25, %v473_v22  ;;  %v514_v29 = vadd.f32 %v874_v25, %v481_v23 }
  0xcd   : > { %554 = vst.msk [vmem:[%s881_s9 + $0xa0] sm:$0xff] %vm533_vm2, %v521_v26 }
  0xce   : > { %562 = vst.msk [vmem:[%s881_s9 + $0xe0] sm:$0xff] %vm533_vm2, %v529_v27 }
  0xcf   : > { %539 = vst.msk [vmem:[%s881_s9 + $0x28] sm:$0xff] %vm533_vm2, %v506_v28 }
  0xd0   : > { %547 = vst.msk [vmem:[%s881_s9 + $0x68] sm:$0xff] %vm533_vm2, %v514_v29  ;;  %v437_v30 = vpop.f32.mrf.mxu2  ;;  %v457_v31 = vpop.f32.mrf.mxu3 }
  0xd1   : > { %v489_v32 = vmul.f32 %v868_v24, %v437_v30  ;;  %v497_v33 = vmul.f32 %v868_v24, %v457_v31  ;;  %v400_v34 = vpop.f32.mrf.mxu0  ;;  %v420_v35 = vpop.f32.mrf.mxu1 }
  0xd2   : > { %v474_v36 = vmul.f32 %v868_v24, %v400_v34  ;;  %v482_v37 = vmul.f32 %v868_v24, %v420_v35 }
  0xd3   : > { %v522_v38 = vadd.f32 %v874_v25, %v489_v32  ;;  %v530_v39 = vadd.f32 %v874_v25, %v497_v33 }
  0xd4   : > { %v507_v40 = vadd.f32 %v874_v25, %v474_v36  ;;  %v515_v41 = vadd.f32 %v874_v25, %v482_v37 }
  0xd5   : > { %555 = vst.msk [vmem:[%s881_s9 + $0xa8] sm:$0xff] %vm533_vm2, %v522_v38 }
  0xd6   : > { %563 = vst.msk [vmem:[%s881_s9 + $0xe8] sm:$0xff] %vm533_vm2, %v530_v39 }
  0xd7   : > { %540 = vst.msk [vmem:[%s881_s9 + $0x30] sm:$0xff] %vm533_vm2, %v507_v40 }
  0xd8   : > { %548 = vst.msk [vmem:[%s881_s9 + $0x70] sm:$0xff] %vm533_vm2, %v515_v41  ;;  %v440_v42 = vpop.f32.mrf.mxu2  ;;  %v460_v43 = vpop.f32.mrf.mxu3 }
  0xd9   : > { %v490_v44 = vmul.f32 %v868_v24, %v440_v42  ;;  %v498_v45 = vmul.f32 %v868_v24, %v460_v43  ;;  %v402_v46 = vpop.f32.mrf.mxu0  ;;  %v422_v47 = vpop.f32.mrf.mxu1 }
  0xda   : > { %v475_v48 = vmul.f32 %v868_v24, %v402_v46  ;;  %v483_v49 = vmul.f32 %v868_v24, %v422_v47 }
  0xdb   : > { %v523_v50 = vadd.f32 %v874_v25, %v490_v44  ;;  %v531_v51 = vadd.f32 %v874_v25, %v498_v45 }
  0xdc   : > { %v508_v52 = vadd.f32 %v874_v25, %v475_v48  ;;  %v516_v53 = vadd.f32 %v874_v25, %v483_v49 }
  0xdd   : > { %556 = vst.msk [vmem:[%s881_s9 + $0xb0] sm:$0xff] %vm533_vm2, %v523_v50 }
  0xde   : > { %564 = vst.msk [vmem:[%s881_s9 + $0xf0] sm:$0xff] %vm533_vm2, %v531_v51 }
  0xdf   : > { %541 = vst.msk [vmem:[%s881_s9 + $0x38] sm:$0xff] %vm533_vm2, %v508_v52 }
  0xe0   : > { %549 = vst.msk [vmem:[%s881_s9 + $0x78] sm:$0xff] %vm533_vm2, %v516_v53  ;;  %v442_v54 = vpop.f32.mrf.mxu2  ;;  %v462_v55 = vpop.f32.mrf.mxu3 }
  0xe1   : > { %v491_v56 = vmul.f32 %v868_v24, %v442_v54  ;;  %v499_v57 = vmul.f32 %v868_v24, %v462_v55 }
  0xe3   : > { %v524_v58 = vadd.f32 %v874_v25, %v491_v56  ;;  %v532_v59 = vadd.f32 %v874_v25, %v499_v57 }
  0xe5   : > { %557 = vst.msk [vmem:[%s881_s9 + $0xb8] sm:$0xff] %vm533_vm2, %v524_v58 }
  0xe6   : > { %565 = vst.msk [vmem:[%s881_s9 + $0xf8] sm:$0xff] %vm533_vm2, %v532_v59 }
  0xe7 PF: > { %s13_s12 = sadd.s32 1, %s780_s12  }
  0xe8   : > { %p10_p4 = scmp.ge.s32.totalorder %s13_s12, 4  }
  0xea   :  { %12 = sbr.rel (!%p10_p4) target bundleno = 1 (0x1), region = 62 }

</bundles_post_ra>
